<compile_context>
chip_gen: v7x
topology: tpu7x:2x2x1
jax: 0.10.0
libtpu: 0.0.40
codegen_flags: <defaults>
</compile_context>

<pallas_src>
import jax
import jax.numpy as jnp
from jax.experimental import pallas as pl
from jax.experimental.pallas import tpu as pltpu

LANES = 128
SUBLANES = 8
MAX_TILE_ROWS = 4096   # (4096,128) f32 block = 2 MiB/input/buffer
NUM_SPLITS = 2         # leading parallel grid axis (uses both TCs on v7x)


def _round_up(v, m):
    return (v + m - 1) // m * m


def _dice_kernel(rows, tile_rows, tiles_per_split, needs_mask):
    groups = tile_rows // SUBLANES

    def kernel(x_ref, t_ref, inter_ref, denom_ref):
        c = pl.program_id(0)
        i = pl.program_id(1)

        # Output blocks (one per split) are resident across the inner "arbitrary"
        # axis and act as accumulators; zero them on the first inner step.
        @pl.when(i == 0)
        def _():
            inter_ref[...] = jnp.zeros_like(inter_ref)
            denom_ref[...] = jnp.zeros_like(denom_ref)

        x = x_ref[...].astype(jnp.float32)
        t = t_ref[...].astype(jnp.float32)
        # Sigmoid goes to the EUP; DMA is the bottleneck regardless.
        s = jax.nn.sigmoid(x)

        if needs_mask:
            # Mask rows past the true row count (covers the ragged last tile and any
            # clamped/duplicated tiles when the grid over-covers the array).
            row_start = (c * tiles_per_split + i) * tile_rows
            row_ids = jax.lax.broadcasted_iota(jnp.int32, (tile_rows, LANES), 0)
            valid = (row_ids + row_start) < rows
            s = jnp.where(valid, s, 0.0)
            t = jnp.where(valid, t, 0.0)

        # Reduce only over the row-group axis -> (8,128) partials (pure VPU vreg
        # adds); the cross-lane/sublane reduction to scalars happens once in the
        # wrapper. The reshape keeps (8,128) tiles intact, so it is layout-free.
        inter_ref[...] += jnp.sum((s * t).reshape(groups, SUBLANES, LANES), axis=0)
        denom_ref[...] += jnp.sum((s + t).reshape(groups, SUBLANES, LANES), axis=0)

    return kernel


def dice_loss(inputs, targets, smooth=1.0):
    """Pallas TPU implementation of DiceLoss.forward (returns a scalar f32)."""
    x = inputs.reshape(-1)
    t = targets.reshape(-1)
    n = x.shape[0]

    # Pad only when the element count is not a multiple of 8*128 (zero-copy for
    # aligned inputs). sigmoid(-1e30)==0 so padded logits contribute nothing.
    chunk = SUBLANES * LANES
    n_pad = _round_up(n, chunk)
    if n_pad != n:
        pad = n_pad - n
        x = jnp.concatenate([x, jnp.full((pad,), -1e30, dtype=x.dtype)])
        t = jnp.concatenate([t, jnp.zeros((pad,), dtype=t.dtype)])

    rows = n_pad // LANES
    x2 = x.reshape(rows, LANES)
    t2 = t.reshape(rows, LANES)

    tile_rows = min(MAX_TILE_ROWS, rows)            # always a multiple of 8
    total_tiles = pl.cdiv(rows, tile_rows)
    num_splits = NUM_SPLITS if total_tiles >= NUM_SPLITS else 1
    tiles_per_split = pl.cdiv(total_tiles, num_splits)
    needs_mask = num_splits * tiles_per_split * tile_rows > rows

    def in_map(c, i):
        # Clamp so over-covering tiles never index past the array; their rows are
        # masked out in-kernel.
        return (jnp.minimum(c * tiles_per_split + i, total_tiles - 1), 0)

    inter_p, denom_p = pl.pallas_call(
        _dice_kernel(rows, tile_rows, tiles_per_split, needs_mask),
        out_shape=(
            jax.ShapeDtypeStruct((num_splits, SUBLANES, LANES), jnp.float32),
            jax.ShapeDtypeStruct((num_splits, SUBLANES, LANES), jnp.float32),
        ),
        grid_spec=pltpu.PrefetchScalarGridSpec(
            num_scalar_prefetch=0,
            grid=(num_splits, tiles_per_split),
            in_specs=[
                pl.BlockSpec((tile_rows, LANES), in_map),
                pl.BlockSpec((tile_rows, LANES), in_map),
            ],
            out_specs=[
                pl.BlockSpec((None, SUBLANES, LANES), lambda c, i: (c, 0, 0)),
                pl.BlockSpec((None, SUBLANES, LANES), lambda c, i: (c, 0, 0)),
            ],
        ),
        compiler_params=pltpu.CompilerParams(
            dimension_semantics=("parallel", "arbitrary"),
        ),
    )(x2, t2)

    # Tiny final combine + dice formula (scalar work) in the wrapper.
    smooth = jnp.float32(smooth)
    intersection = jnp.sum(inter_p)
    denom = jnp.sum(denom_p)
    dice = (2.0 * intersection + smooth) / (denom + smooth)
    return 1.0 - dice


def dice_loss_ref(inputs, targets, smooth=1.0):
    s = jax.nn.sigmoid(inputs.astype(jnp.float32)).reshape(-1)
    t = targets.astype(jnp.float32).reshape(-1)
    inter = jnp.sum(s * t)
    dice = (2.0 * inter + smooth) / (jnp.sum(s) + jnp.sum(t) + smooth)
    return 1.0 - dice


def _check(shape, key, atol, rtol):
    k1, k2 = jax.random.split(key)
    x = jax.random.normal(k1, shape, dtype=jnp.float32)
    t = (jax.random.uniform(k2, shape) > 0.5).astype(jnp.float32)
    out = jax.block_until_ready(dice_loss(x, t, smooth=1.0))
    ref = dice_loss_ref(x, t, smooth=1.0)
    assert jnp.allclose(out, ref, atol=atol, rtol=rtol), (shape, out, ref)


if __name__ == "__main__":
    key = jax.random.PRNGKey(0)
    k0, k1, k2 = jax.random.split(key, 3)

    # Primary: NCHW logits + binary targets, aligned (zero-copy, single tile).
    _check((2, 4, 16, 16), k0, atol=1e-5, rtol=1e-5)
    # Ragged element count: exercises minimal padding + neutral pad values + masking.
    _check((2, 3, 17, 19), k1, atol=1e-5, rtol=1e-5)
    # Multi-tile case: exercises the parallel split + big-block streaming path.
    _check((8, 4, 128, 128), k2, atol=1e-4, rtol=1e-4)

    print("KERNEL_OK")
</pallas_src>

<mosaic_0001>
module attributes {stable_mosaic.version = 11 : i64} {
  func.func @kernel(%arg0: i32, %arg1: i32, %arg2: memref<16x128xf32, #tpu.memory_space<vmem>>, %arg3: memref<16x128xf32, #tpu.memory_space<vmem>>, %arg4: memref<1x8x128xf32, #tpu.memory_space<vmem>>, %arg5: memref<1x8x128xf32, #tpu.memory_space<vmem>>) attributes {dimension_semantics = [#tpu.dimension_semantics<parallel>, #tpu.dimension_semantics<arbitrary>], iteration_bounds = array<i64: 1, 1>, scalar_prefetch = 0 : i64, scratch_operands = 0 : i64, tpu.core_type = #tpu.core_type<tc>, window_params = [{transform_indices = @transform_0, window_bounds = array<i64: 16, 128>}, {transform_indices = @transform_1, window_bounds = array<i64: 16, 128>}, {transform_indices = @transform_2, window_bounds = array<i64: 1, 8, 128>}, {transform_indices = @transform_3, window_bounds = array<i64: 1, 8, 128>}]} {
    %c0_i32 = arith.constant 0 : i32
    %0 = arith.cmpi eq, %arg1, %c0_i32 : i32
    %1 = arith.extui %0 : i1 to i32
    %c0_i32_0 = arith.constant 0 : i32
    %2 = arith.cmpi ne, %1, %c0_i32_0 : i32
    scf.if %2 {
      %cst_18 = arith.constant 0.000000e+00 : f32
      %28 = vector.broadcast %cst_18 : f32 to vector<8x128xf32>
      %c0_19 = arith.constant 0 : index
      %c0_20 = arith.constant 0 : index
      %c0_21 = arith.constant 0 : index
      %29 = vector.load %arg4[%c0_19, %c0_20, %c0_21] : memref<1x8x128xf32, #tpu.memory_space<vmem>>, vector<1x8x128xf32>
      %30 = vector.shape_cast %29 : vector<1x8x128xf32> to vector<8x128xf32>
      %31 = vector.shape_cast %28 : vector<8x128xf32> to vector<1x8x128xf32>
      tpu.vector_store %arg4[%c0_19, %c0_20, %c0_21], %31 {strides = array<i32>} : memref<1x8x128xf32, #tpu.memory_space<vmem>>, vector<1x8x128xf32>,
      %cst_22 = arith.constant 0.000000e+00 : f32
      %32 = vector.broadcast %cst_22 : f32 to vector<8x128xf32>
      %c0_23 = arith.constant 0 : index
      %c0_24 = arith.constant 0 : index
      %c0_25 = arith.constant 0 : index
      %33 = vector.load %arg5[%c0_23, %c0_24, %c0_25] : memref<1x8x128xf32, #tpu.memory_space<vmem>>, vector<1x8x128xf32>
      %34 = vector.shape_cast %33 : vector<1x8x128xf32> to vector<8x128xf32>
      %35 = vector.shape_cast %32 : vector<8x128xf32> to vector<1x8x128xf32>
      tpu.vector_store %arg5[%c0_23, %c0_24, %c0_25], %35 {strides = array<i32>} : memref<1x8x128xf32, #tpu.memory_space<vmem>>, vector<1x8x128xf32>,
    } else {
    }
    %c0 = arith.constant 0 : index
    %c0_1 = arith.constant 0 : index
    %3 = vector.load %arg2[%c0, %c0_1] : memref<16x128xf32, #tpu.memory_space<vmem>>, vector<16x128xf32>
    %c0_2 = arith.constant 0 : index
    %c0_3 = arith.constant 0 : index
    %4 = vector.load %arg3[%c0_2, %c0_3] : memref<16x128xf32, #tpu.memory_space<vmem>>, vector<16x128xf32>
    %5 = arith.negf %3 : vector<16x128xf32>
    %6 = math.exp %5 : vector<16x128xf32>
    %cst = arith.constant 1.000000e+00 : f32
    %7 = vector.broadcast %cst : f32 to vector<16x128xf32>
    %8 = arith.addf %7, %6 : vector<16x128xf32>
    %9 = arith.divf %7, %8 : vector<16x128xf32>
    %c0_4 = arith.constant 0 : index
    %c0_5 = arith.constant 0 : index
    %c0_6 = arith.constant 0 : index
    %10 = vector.load %arg4[%c0_4, %c0_5, %c0_6] : memref<1x8x128xf32, #tpu.memory_space<vmem>>, vector<1x8x128xf32>
    %11 = vector.shape_cast %10 : vector<1x8x128xf32> to vector<8x128xf32>
    %12 = arith.mulf %9, %4 : vector<16x128xf32>
    %13 = vector.shape_cast %12 : vector<16x128xf32> to vector<2x8x128xf32>
    %cst_7 = arith.constant dense<0.000000e+00> : vector<8x128xf32>
    %14 = vector.multi_reduction <add>, %13, %cst_7 [0] : vector<2x8x128xf32> to vector<8x128xf32>
    %15 = arith.addf %11, %14 : vector<8x128xf32>
    %c0_8 = arith.constant 0 : index
    %c0_9 = arith.constant 0 : index
    %c0_10 = arith.constant 0 : index
    %16 = vector.load %arg4[%c0_8, %c0_9, %c0_10] : memref<1x8x128xf32, #tpu.memory_space<vmem>>, vector<1x8x128xf32>
    %17 = vector.shape_cast %16 : vector<1x8x128xf32> to vector<8x128xf32>
    %18 = vector.shape_cast %15 : vector<8x128xf32> to vector<1x8x128xf32>
    tpu.vector_store %arg4[%c0_8, %c0_9, %c0_10], %18 {strides = array<i32>} : memref<1x8x128xf32, #tpu.memory_space<vmem>>, vector<1x8x128xf32>,
    %c0_11 = arith.constant 0 : index
    %c0_12 = arith.constant 0 : index
    %c0_13 = arith.constant 0 : index
    %19 = vector.load %arg5[%c0_11, %c0_12, %c0_13] : memref<1x8x128xf32, #tpu.memory_space<vmem>>, vector<1x8x128xf32>
    %20 = vector.shape_cast %19 : vector<1x8x128xf32> to vector<8x128xf32>
    %21 = arith.addf %9, %4 : vector<16x128xf32>
    %22 = vector.shape_cast %21 : vector<16x128xf32> to vector<2x8x128xf32>
    %cst_14 = arith.constant dense<0.000000e+00> : vector<8x128xf32>
    %23 = vector.multi_reduction <add>, %22, %cst_14 [0] : vector<2x8x128xf32> to vector<8x128xf32>
    %24 = arith.addf %20, %23 : vector<8x128xf32>
    %c0_15 = arith.constant 0 : index
    %c0_16 = arith.constant 0 : index
    %c0_17 = arith.constant 0 : index
    %25 = vector.load %arg5[%c0_15, %c0_16, %c0_17] : memref<1x8x128xf32, #tpu.memory_space<vmem>>, vector<1x8x128xf32>
    %26 = vector.shape_cast %25 : vector<1x8x128xf32> to vector<8x128xf32>
    %27 = vector.shape_cast %24 : vector<8x128xf32> to vector<1x8x128xf32>
    tpu.vector_store %arg5[%c0_15, %c0_16, %c0_17], %27 {strides = array<i32>} : memref<1x8x128xf32, #tpu.memory_space<vmem>>, vector<1x8x128xf32>,
    return
  }
  func.func @transform_0(%arg0: i32, %arg1: i32) -> (i32, i32) {
    %c1_i32 = arith.constant 1 : i32
    %0 = arith.muli %arg0, %c1_i32 : i32
    %1 = arith.addi %0, %arg1 : i32
    %c0_i32 = arith.constant 0 : i32
    %2 = arith.minsi %1, %c0_i32 : i32
    %c0_i32_0 = arith.constant 0 : i32
    %c0_i32_1 = arith.constant 0 : i32
    return %2, %c0_i32_0 : i32, i32
  }
  func.func @transform_1(%arg0: i32, %arg1: i32) -> (i32, i32) {
    %c1_i32 = arith.constant 1 : i32
    %0 = arith.muli %arg0, %c1_i32 : i32
    %1 = arith.addi %0, %arg1 : i32
    %c0_i32 = arith.constant 0 : i32
    %2 = arith.minsi %1, %c0_i32 : i32
    %c0_i32_0 = arith.constant 0 : i32
    %c0_i32_1 = arith.constant 0 : i32
    return %2, %c0_i32_0 : i32, i32
  }
  func.func @transform_2(%arg0: i32, %arg1: i32) -> (i32, i32, i32) {
    %c0_i32 = arith.constant 0 : i32
    %c0_i32_0 = arith.constant 0 : i32
    %c0_i32_1 = arith.constant 0 : i32
    return %arg0, %c0_i32, %c0_i32_0 : i32, i32, i32
  }
  func.func @transform_3(%arg0: i32, %arg1: i32) -> (i32, i32, i32) {
    %c0_i32 = arith.constant 0 : i32
    %c0_i32_0 = arith.constant 0 : i32
    %c0_i32_1 = arith.constant 0 : i32
    return %arg0, %c0_i32, %c0_i32_0 : i32, i32, i32
  }
}

</mosaic_0001>

<bundles_post_ra>
// kernel: tpu_custom_call.1
= control target key start
LH: loop header
LB: loop body
LE: loop exit
PB: predicated region body
PF: predicated region fallthrough
CT: control target
= control target key end

     0   :  { %9 = vsyncpa [#allocation3], 0  ;;  %s318_s0 = inlined_call_operand.hbm [shape: f32[16,128], index: 0, kind: input, shape index: {}]   ;;  %s319_s1 = inlined_call_operand.hbm [shape: f32[16,128], index: 1, kind: input, shape index: {}]   ;;  %s320_s2 = inlined_call_operand.hbm [shape: f32[1,8,128], index: 2, kind: output, shape index: {0}]   ;;  %s321_s3 = inlined_call_operand.hbm [shape: f32[1,8,128], index: 3, kind: output, shape index: {1}]  }
   0x1   :  { %10 = vsyncpa [#allocation6], 0 }
   0x2   :  { %11 = vsyncpa [#allocation4], 0 }
   0x3   :  { %12 = vsyncpa [#allocation9], 0  ;;  %s244_s12 = smov [#allocation2]   ;;  %s148_s16 = scalar_lea.hbm %s318_s0, 256 }
   0x4   :  { %s24_s13 = sshll.u32 %s244_s12, 4  ;;  %p149_p0 = scmp.ne.s32.totalorder %s318_s0, %s148_s16  ;;  %s25_s13 = int_to_ptr.vmem [resolvable:$true] %s24_s13 }
   0x5   :  { %p152_p1 = scmp.lt.u32.totalorder %s148_s16, %s318_s0 }
   0x7   :  { %p154_p2 = pnand %p152_p1, %p149_p0 }
   0x9   :  { %157 = shalt.err (!%p154_p2)
}
   0xa   :  { %s158_s21 = scalar_lea.vmem %s25_s13, 256  ;;  %p163_p4 = scmp.lt.s32.totalorder %s25_s13, %s25_s13 }
   0xb   :  { %p159_p3 = scmp.ne.s32.totalorder %s25_s13, %s158_s21  ;;  %p164_p5 = scmp.lt.s32.totalorder %s158_s21, %s158_s21 }
   0xd   :  { %p165_p6 = por %p164_p5, %p163_p4 }
   0xf   :  { %p166_p7 = pnand %p165_p6, %p159_p3 }
  0x11   :  { %169 = shalt.err (!%p166_p7)
}
  0x12   :  { %s245_s22 = smov 128   ;;  %s246_s23 = smov 8  }
  0x13   :  { %30 = dma.hbm_to_vmem [thread:$0]  %s318_s0, 256, %s25_s13, [#allocation3], %s245_s22, %s245_s22, %s246_s23  }
  0x14   :  { %s247_s26 = smov [#allocation5]   ;;  %s170_s30 = scalar_lea.hbm %s319_s1, 256 }
  0x15   :  { %s42_s27 = sshll.u32 %s247_s26, 4  ;;  %p171_p8 = scmp.ne.s32.totalorder %s319_s1, %s170_s30  ;;  %s43_s27 = int_to_ptr.vmem [resolvable:$true] %s42_s27 }
  0x16   :  { %p174_p9 = scmp.lt.u32.totalorder %s170_s30, %s319_s1 }
  0x18   :  { %p176_p10 = pnand %p174_p9, %p171_p8 }
  0x1a   :  { %179 = shalt.err (!%p176_p10)
}
  0x1b   :  { %s180_s8 = scalar_lea.vmem %s43_s27, 256  ;;  %p185_p12 = scmp.lt.s32.totalorder %s43_s27, %s43_s27 }
  0x1c   :  { %p181_p11 = scmp.ne.s32.totalorder %s43_s27, %s180_s8  ;;  %p186_p13 = scmp.lt.s32.totalorder %s180_s8, %s180_s8 }
  0x1e   :  { %p187_p0 = por %p186_p13, %p185_p12 }
  0x20   :  { %p188_p1 = pnand %p187_p0, %p181_p11 }
  0x22   :  { %191 = shalt.err (!%p188_p1)
}
  0x23   :  { %48 = dma.hbm_to_vmem [thread:$0]  %s319_s1, 256, %s43_s27, [#allocation6], %s245_s22, %s245_s22, %s246_s23  }
  0x24   :  { %236 = dma.done.wait [#allocation3], 256  }
  0x25   :  { %237 = vsyncadd [#allocation3], 4294967040 }
  0x26   :  { %238 = dma.done.wait [#allocation6], 256  }
  0x27   :  { %239 = vsyncadd [#allocation6], 4294967040  ;;  %v69_v0 = vld [vmem:[#allocation2] sm:$0xff]  ;;  %v70_v1 = vld [vmem:[#allocation2 + $0x8] sm:$0xff]  ;;  %s248_s1 = smov [#allocation7]   ;;  %s249_s11 = smov [#allocation8]  }
  0x28   :  { %v131_v2 = vmul.f32 -1.442695, %v69_v0  ;;  %v132_v3 = vmul.f32 -1.442695, %v70_v1  ;;  %v71_v8 = vld [vmem:[#allocation5] sm:$0xff]  ;;  %v72_v9 = vld [vmem:[#allocation5 + $0x8] sm:$0xff] }
  0x29   :  { %s103_s10 = sshll.u32 %s248_s1, 4  ;;  %s113_s12 = sshll.u32 %s249_s11, 4  ;;  %s104_s10 = int_to_ptr.vmem [resolvable:$true] %s103_s10  ;;  %s114_s12 = int_to_ptr.vmem [resolvable:$true] %s113_s12 }
  0x2a   :  { %140 = vpow2.f32 %v131_v2  ;;  %s192_s13 = scalar_lea.vmem %s104_s10, 128  ;;  %p197_p3 = scmp.lt.s32.totalorder %s104_s10, %s104_s10 }
  0x2b   :  { %142 = vpow2.f32 %v132_v3  ;;  %p193_p2 = scmp.ne.s32.totalorder %s104_s10, %s192_s13  ;;  %p198_p4 = scmp.lt.s32.totalorder %s192_s13, %s192_s13 }
  0x2d   :  { %p199_p5 = por %p198_p4, %p197_p3 }
  0x2f   :  { %p200_p6 = pnand %p199_p5, %p193_p2 }
  0x34   :  { %v141_v4 = vpop.eup %140 }
  0x35   :  { %v143_v5 = vpop.eup %142  ;;  %v79_v6 = vadd.f32 1.0, %v141_v4 }
  0x36   :  { %v80_v7 = vadd.f32 1.0, %v143_v5 }
  0x37   :  { %144 = vrcp.f32 %v79_v6 }
  0x38   :  { %146 = vrcp.f32 %v80_v7 }
  0x41   :  { %v145_v10 = vpop.eup %144 }
  0x42   :  { %v147_v11 = vpop.eup %146  ;;  %v86_v12 = vmul.f32 %v145_v10, %v71_v8  ;;  %v92_v13 = vadd.f32 %v145_v10, %v71_v8 }
  0x43   :  { %v87_v14 = vmul.f32 %v147_v11, %v72_v9  ;;  %v93_v15 = vadd.f32 %v147_v11, %v72_v9 }
  0x45   :  { %v88_v16 = vadd.f32 %v87_v14, %v86_v12  ;;  %v94_v17 = vadd.f32 %v93_v15, %v92_v13 }
  0x47   :  { %90 = vst [vmem:[#allocation7] sm:$0xff] %v88_v16  ;;  %96 = vst [vmem:[#allocation8] sm:$0xff] %v94_v17 }
  0x48   :  { %203 = shalt.err (!%p200_p6)
}
  0x49   :  { %s204_s16 = scalar_lea.hbm %s320_s2, 128 }
  0x4a   :  { %p205_p7 = scmp.ne.s32.totalorder %s320_s2, %s204_s16  ;;  %p208_p8 = scmp.lt.u32.totalorder %s204_s16, %s320_s2 }
  0x4c   :  { %p210_p9 = pnand %p208_p8, %p205_p7 }
  0x4e   :  { %213 = shalt.err (!%p210_p9)
}
  0x4f   :  { %106 = dma.vmem_to_hbm [thread:$0]  %s104_s10, 128, %s320_s2, [#allocation4]  }
  0x50   :  { %s214_s23 = scalar_lea.vmem %s114_s12, 128  ;;  %p219_p11 = scmp.lt.s32.totalorder %s114_s12, %s114_s12 }
  0x51   :  { %p215_p10 = scmp.ne.s32.totalorder %s114_s12, %s214_s23  ;;  %p220_p12 = scmp.lt.s32.totalorder %s214_s23, %s214_s23 }
  0x53   :  { %p221_p13 = por %p220_p12, %p219_p11 }
  0x55   :  { %p222_p0 = pnand %p221_p13, %p215_p10 }
  0x57   :  { %225 = shalt.err (!%p222_p0)
}
  0x58   :  { %s226_s26 = scalar_lea.hbm %s321_s3, 128 }
  0x59   :  { %p227_p1 = scmp.ne.s32.totalorder %s321_s3, %s226_s26  ;;  %p230_p2 = scmp.lt.u32.totalorder %s226_s26, %s321_s3 }
  0x5b   :  { %p232_p3 = pnand %p230_p2, %p227_p1 }
  0x5d   :  { %235 = shalt.err (!%p232_p3)
}
  0x5e   :  { %116 = dma.vmem_to_hbm [thread:$0]  %s114_s12, 128, %s321_s3, [#allocation9]  }
  0x5f   :  { %240 = dma.done.wait [#allocation4], 128  }
  0x60   :  { %241 = vsyncadd [#allocation4], 4294967168 }
  0x61   :  { %242 = dma.done.wait [#allocation9], 128  }
  0x62   :  { %243 = vsyncadd [#allocation9], 4294967168 }
  0x63   :  { %123 = vsyncpa [#allocation3], 1 }
  0x64   :  { %124 = vsyncpa [#allocation6], 1 }
  0x65   :  { %125 = vsyncpa [#allocation4], 1 }
  0x66   :  { %126 = vsyncpa [#allocation9], 1 }

</bundles_post_ra>
